<compile_context>
chip_gen: v7x
topology: tpu7x:2x2x1
jax: 0.10.0
libtpu: 0.0.40
codegen_flags: <defaults>
</compile_context>

<pallas_src>
import jax
import jax.numpy as jnp
from jax import lax
from jax.experimental import pallas as pl
from jax.experimental.pallas import tpu as pltpu


_LANE = 128                      # vreg lane width
_SUBLANE = 8                     # vreg sublane count
_LOGITS_BUF_BYTES = 8 * 1024 * 1024   # target size of one pipelined logits buffer


def _round_up(x, m):
    return ((x + m - 1) // m) * m


def _ce_tile_kernel(y_ref, logits_ref, out_ref):
    """One (TILE_T, C_pad) tile -> scalar partial NLL sum broadcast over 128 lanes."""
    logits = logits_ref[...].astype(jnp.float32)               # cast AFTER the DMA (VPU)
    y = y_ref[...]                                             # (TILE_T, 1) int32

    # numerically stable row-wise logsumexp
    m = jnp.max(logits, axis=-1, keepdims=True)                # (TILE_T, 1)
    lse = jnp.log(jnp.sum(jnp.exp(logits - m), axis=-1, keepdims=True)) + m

    # gather logit at the target class via one-hot mask (no dynamic gather on TPU)
    col = lax.broadcasted_iota(jnp.int32, logits.shape, 1)     # (TILE_T, C_pad)
    picked = jnp.sum(jnp.where(col == y, logits, 0.0), axis=-1, keepdims=True)

    # negative targets = padded rows / torch ignore_index -> contribute 0
    per_row = jnp.where(y >= 0, lse - picked, 0.0)             # (TILE_T, 1)

    out_ref[...] = jnp.broadcast_to(jnp.sum(per_row), (1, 1, _LANE)).astype(jnp.float32)


def cross_entropy_time_distributed_loss(y_hat, y):
    """y_hat: (1, T, C) float logits (any float dtype); y: (1, T) integer class ids."""
    logits = jnp.squeeze(y_hat, axis=0)                        # (T, C), keep native dtype
    tgt = jnp.squeeze(y, axis=0).astype(jnp.int32)             # (T,)
    T, C = logits.shape
    itemsize = jnp.dtype(logits.dtype).itemsize

    # lane-dense class axis
    c_pad = _round_up(C, _LANE)

    # biggest row tile that keeps one double-buffered logits tile cheap in VMEM
    max_rows = max(_SUBLANE,
                   (_LOGITS_BUF_BYTES // (c_pad * itemsize)) // _SUBLANE * _SUBLANE)
    if T <= max_rows and T <= 1024:
        tile_t = _round_up(T, _SUBLANE)
    else:
        tile_t = min(1024, max_rows)
    t_pad = _round_up(T, tile_t)
    num_tiles = t_pad // tile_t

    # pad classes / extra rows with a very negative finite value: vanishes under exp();
    # padded rows additionally get target = -1 and are masked in-kernel.
    neg = jnp.asarray(jnp.finfo(logits.dtype).min, dtype=logits.dtype)
    logits_p = jnp.pad(logits, ((0, t_pad - T), (0, c_pad - C)), constant_values=neg)
    tgt_p = jnp.pad(tgt, (0, t_pad - T), constant_values=-1).reshape(t_pad, 1)

    cost = pl.CostEstimate(
        flops=6 * t_pad * c_pad,
        transcendentals=t_pad * c_pad,
        bytes_accessed=t_pad * c_pad * itemsize + t_pad * 4 + num_tiles * _LANE * 4,
    )

    partial = pl.pallas_call(
        _ce_tile_kernel,
        out_shape=jax.ShapeDtypeStruct((num_tiles, 1, _LANE), jnp.float32),
        grid_spec=pltpu.PrefetchScalarGridSpec(
            num_scalar_prefetch=0,
            grid=(num_tiles,),
            in_specs=[
                pl.BlockSpec((tile_t, 1), lambda i: (i, 0)),        # targets (int32)
                pl.BlockSpec((tile_t, c_pad), lambda i: (i, 0)),    # logits (native dtype)
            ],
            out_specs=pl.BlockSpec((1, 1, _LANE), lambda i: (i, 0, 0)),
        ),
        compiler_params=pltpu.CompilerParams(
            dimension_semantics=("parallel",),     # tiles are independent -> megacore on v7x
            vmem_limit_bytes=48 * 1024 * 1024,
        ),
        cost_estimate=cost,
    )(tgt_p, logits_p)

    # mean over non-ignored targets (matches torch reduction='mean'; negative targets —
    # including torch's default ignore_index=-100 — are excluded from sum and count).
    num_valid = jnp.sum(tgt >= 0).astype(jnp.float32)
    return jnp.sum(partial[:, 0, 0]) / num_valid


def _reference_loss(y_hat, y):
    """Pure-JAX reference of torch's CrossEntropyLoss(mean) after squeeze(0)."""
    logits = jnp.squeeze(y_hat, axis=0).astype(jnp.float32)
    tgt = jnp.squeeze(y, axis=0).astype(jnp.int32)
    logz = jax.scipy.special.logsumexp(logits, axis=-1)
    picked = jnp.take_along_axis(logits, tgt[:, None], axis=-1)[:, 0]
    return jnp.mean(logz - picked)


if __name__ == "__main__":
    T, C = 8, 32  # timesteps, num classes (module has no parameters)
    key = jax.random.PRNGKey(0)
    k1, k2 = jax.random.split(key)
    base_logits = jax.random.normal(k1, (1, T, C), dtype=jnp.float32)
    y = jax.random.randint(k2, (1, T), 0, C, dtype=jnp.int32)

    ok = True
    for dtype in (jnp.float32, jnp.bfloat16):
        y_hat = base_logits.astype(dtype)
        loss = cross_entropy_time_distributed_loss(y_hat, y)
        jax.block_until_ready(loss)
        ref = _reference_loss(y_hat, y)
        if not jnp.allclose(loss, ref, rtol=1e-5, atol=1e-5):
            ok = False
            print("MISMATCH", dtype, loss, ref)

    if ok:
        print("KERNEL_OK")
</pallas_src>

<mosaic_0001>
module attributes {stable_mosaic.version = 11 : i64} {
  func.func @_ce_tile_kernel(%arg0: i32, %arg1: memref<8x1xi32, #tpu.memory_space<vmem>>, %arg2: memref<8x128xf32, #tpu.memory_space<vmem>>, %arg3: memref<1x1x128xf32, #tpu.memory_space<vmem>>) attributes {dimension_semantics = [#tpu.dimension_semantics<parallel>], iteration_bounds = array<i64: 1>, scalar_prefetch = 0 : i64, scratch_operands = 0 : i64, tpu.core_type = #tpu.core_type<tc>, window_params = [{transform_indices = @transform_0, window_bounds = array<i64: 8, 1>}, {transform_indices = @transform_1, window_bounds = array<i64: 8, 128>}, {transform_indices = @transform_2, window_bounds = array<i64: 1, 1, 128>}]} {
    %c0 = arith.constant 0 : index
    %c0_0 = arith.constant 0 : index
    %0 = vector.load %arg2[%c0, %c0_0] : memref<8x128xf32, #tpu.memory_space<vmem>>, vector<8x128xf32>
    %c0_1 = arith.constant 0 : index
    %c0_2 = arith.constant 0 : index
    %1 = vector.load %arg1[%c0_1, %c0_2] : memref<8x1xi32, #tpu.memory_space<vmem>>, vector<8x1xi32>
    %cst = arith.constant dense<0xFF800000> : vector<8xf32>
    %2 = vector.multi_reduction <maximumf>, %0, %cst [1] : vector<8x128xf32> to vector<8xf32>
    %3 = vector.shape_cast %2 : vector<8xf32> to vector<8x1xf32>
    %4 = vector.broadcast %3 : vector<8x1xf32> to vector<8x128xf32>
    %5 = arith.subf %0, %4 : vector<8x128xf32>
    %6 = math.exp %5 : vector<8x128xf32>
    %cst_3 = arith.constant dense<0.000000e+00> : vector<8xf32>
    %7 = vector.multi_reduction <add>, %6, %cst_3 [1] : vector<8x128xf32> to vector<8xf32>
    %8 = vector.shape_cast %7 : vector<8xf32> to vector<8x1xf32>
    %9 = math.log %8 : vector<8x1xf32>
    %10 = arith.addf %9, %3 : vector<8x1xf32>
    %11 = tpu.iota {dimensions = array<i32: 1>} : vector<8x128xi32>
    %12 = vector.broadcast %1 : vector<8x1xi32> to vector<8x128xi32>
    %13 = arith.cmpi eq, %11, %12 : vector<8x128xi32>
    %cst_4 = arith.constant 0.000000e+00 : f32
    %14 = vector.broadcast %cst_4 : f32 to vector<8x128xf32>
    %15 = arith.select %13, %0, %14 : vector<8x128xi1>, vector<8x128xf32>
    %cst_5 = arith.constant dense<0.000000e+00> : vector<8xf32>
    %16 = vector.multi_reduction <add>, %15, %cst_5 [1] : vector<8x128xf32> to vector<8xf32>
    %17 = vector.shape_cast %16 : vector<8xf32> to vector<8x1xf32>
    %c0_i32 = arith.constant 0 : i32
    %18 = vector.broadcast %c0_i32 : i32 to vector<8x1xi32>
    %19 = arith.cmpi sge, %1, %18 : vector<8x1xi32>
    %20 = arith.subf %10, %17 : vector<8x1xf32>
    %cst_6 = arith.constant 0.000000e+00 : f32
    %21 = vector.broadcast %cst_6 : f32 to vector<8x1xf32>
    %22 = arith.select %19, %20, %21 : vector<8x1xi1>, vector<8x1xf32>
    %23 = vector.shape_cast %22 : vector<8x1xf32> to vector<1x8x1xf32>
    %cst_7 = arith.constant dense<0.000000e+00> : vector<1xf32>
    %24 = vector.multi_reduction <add>, %23, %cst_7 [1, 2] : vector<1x8x1xf32> to vector<1xf32>
    %25 = vector.shape_cast %24 : vector<1xf32> to vector<1x1x1xf32>
    %26 = vector.extract %25[0, 0, 0] : f32 from vector<1x1x1xf32>
    %27 = vector.broadcast %26 : f32 to vector<1x1x128xf32>
    %c0_8 = arith.constant 0 : index
    %c0_9 = arith.constant 0 : index
    %c0_10 = arith.constant 0 : index
    %28 = vector.load %arg3[%c0_8, %c0_9, %c0_10] : memref<1x1x128xf32, #tpu.memory_space<vmem>>, vector<1x1x128xf32>
    tpu.vector_store %arg3[%c0_8, %c0_9, %c0_10], %27 {strides = array<i32>} : memref<1x1x128xf32, #tpu.memory_space<vmem>>, vector<1x1x128xf32>,
    return
  }
  func.func @transform_0(%arg0: i32) -> (i32, i32) {
    %c0_i32 = arith.constant 0 : i32
    %c0_i32_0 = arith.constant 0 : i32
    return %arg0, %c0_i32 : i32, i32
  }
  func.func @transform_1(%arg0: i32) -> (i32, i32) {
    %c0_i32 = arith.constant 0 : i32
    %c0_i32_0 = arith.constant 0 : i32
    return %arg0, %c0_i32 : i32, i32
  }
  func.func @transform_2(%arg0: i32) -> (i32, i32, i32) {
    %c0_i32 = arith.constant 0 : i32
    %c0_i32_0 = arith.constant 0 : i32
    %c0_i32_1 = arith.constant 0 : i32
    return %arg0, %c0_i32, %c0_i32_0 : i32, i32, i32
  }
}

</mosaic_0001>

<bundles_post_ra>
// kernel: tpu_custom_call.1
= control target key start
LH: loop header
LB: loop body
LE: loop exit
PB: predicated region body
PF: predicated region fallthrough
CT: control target
= control target key end

     0   :  { %s131_s0 = inlined_call_operand.vmem [shape: s32[8,1], index: 0, kind: input, shape index: {}]   ;;  %s132_s1 = inlined_call_operand.vmem [shape: f32[8,128], index: 1, kind: input, shape index: {}]   ;;  %s133_s2 = inlined_call_operand.hbm [shape: f32[1,1,128], index: 2, kind: output, shape index: {}]  }
   0x1   :  { %v12_v0 = vld [vmem:[%s132_s1] sm:$0xff] }
   0x2   :  { %7 = vsyncpa [#allocation3], 0  ;;  %14 = vmax.xlane.f32.xlu0 %v12_v0  ;;  %v96_v1 = vmov 0   ;;  %v13_v2 = vld [vmem:[%s131_s0] sm:$0xff]  ;;  %v24_v6 = vlaneseq  ;;  %vm36_vm2 = vcmask 7168   ;;  %s97_s0 = smov [#allocation2]  }
   0x3   :  { %67 = vset.pattern.permute.xlu0 %v96_v1  ;;  %vm33_vm1 = vcmp.ge.s32.totalorder %v13_v2, 0  ;;  %s55_s1 = sshll.u32 %s97_s0, 4  ;;  %s56_s1 = int_to_ptr.vmem [resolvable:$true] %s55_s1 }
   0x4   :  { %v25_v7 = vand.u32 127, %v24_v6  ;;  %s72_s14 = scalar_lea.vmem %s56_s1, 16  ;;  %s76_s15 = scalar_lea.vmem %s56_s1, 32 }
   0x5   :  { %p73_p0 = scmp.ne.s32.totalorder %s56_s1, %s72_s14  ;;  %p77_p1 = scmp.lt.s32.totalorder %s56_s1, %s56_s1 }
   0x6   :  { %p78_p2 = scmp.lt.s32.totalorder %s76_s15, %s72_s14 }
   0x8   :  { %p79_p3 = por %p78_p2, %p77_p1 }
   0xa   :  { %p80_p4 = pnand %p79_p3, %p73_p0 }
  0x18   :  { %27 = vperm.xlu0 %67, %v13_v2  }
  0x8f   :  { %v15_v3 = vpop.xlane.xlu0 %14 }
  0x90   :  { %v16_v4 = vsub.f32 %v12_v0, %v15_v3 }
  0x92   :  { %v17_v5 = vmul.f32 1.442695, %v16_v4 }
  0x94   :  { %68 = vpow2.f32 %v17_v5 }
  0x97   :  { %v28_v8 = vpop.permute.xlu0 %27 }
  0x98   :  { %vm29_vm0 = vcmp.eq.s32.totalorder %v25_v7, %v28_v8 }
  0x99   :  { %v30_v10 = vsel %vm29_vm0, %v12_v0, 0.0 }
  0x9e   :  { %v69_v9 = vpop.eup %68 }
  0x9f   :  { %19 = vadd.xlane.f32.xlu1 %v69_v9 }
  0xa3   :  { %31 = vadd.xlane.f32.xlu1 %v30_v10 }
 0x12c   :  { %v20_v11 = vpop.xlane.xlu1 %19 }
 0x12d   :  { %70 = vlog2.f32 %v20_v11 }
 0x130   :  { %v32_v14 = vpop.xlane.xlu1 %31 }
 0x137   :  { %v71_v12 = vpop.eup %70 }
 0x138   :  { %v22_v13 = vmul.f32 0.6931472, %v71_v12 }
 0x13a   :  { %v23_v15 = vadd.f32 %v22_v13, %v15_v3 }
 0x13c   :  { %v34_v16 = vsub.f32 %v23_v15, %v32_v14 }
 0x13e   :  { %v35_v17 = vsel %vm33_vm1, %v34_v16, 0.0 }
 0x13f   :  { %v37_v18 = vsel %vm36_vm2, %v35_v17, 0.0 }
 0x140   :  { %38 = vadd.xlane.f32.xlu1 %v37_v18 }
 0x1cd   :  { %v39_v19 = vpop.xlane.xlu1 %38 }
 0x1ce   :  { %v40_v20 = vrot.slane %v39_v19, 4 }
 0x1d0   :  { %v41_v21 = vadd.f32 %v40_v20, %v39_v19 }
 0x1d2   :  { %v42_v22 = vrot.slane %v41_v21, 2 }
 0x1d4   :  { %v43_v23 = vadd.f32 %v42_v22, %v41_v21 }
 0x1d6   :  { %v44_v24 = vrot.slane %v43_v23, 1 }
 0x1d8   :  { %v45_v25 = vadd.f32 %v44_v24, %v43_v23 }
 0x1da   :  { %63 = vpush %v45_v25 }
 0x20b   :  { %s64_s13 = spop %63 }
 0x20c   :  { %v47_v26 = vstv %s64_s13 }
 0x20d   :  { %48 = vst [vmem:[#allocation2] sm:$0x1] %v47_v26 }
 0x20e   :  { %83 = shalt.err (!%p80_p4)
}
 0x20f   :  { %s84_s18 = scalar_lea.hbm %s133_s2, 16 }
 0x210   :  { %p85_p5 = scmp.ne.s32.totalorder %s133_s2, %s84_s18  ;;  %p88_p6 = scmp.lt.u32.totalorder %s84_s18, %s133_s2 }
 0x212   :  { %p90_p7 = pnand %p88_p6, %p85_p5 }
 0x214   :  { %93 = shalt.err (!%p90_p7)
}
 0x215   :  { %58 = dma.vmem_to_hbm [thread:$0]  %s56_s1, 16, %s133_s2, [#allocation3]  }
 0x216   :  { %94 = dma.done.wait [#allocation3], 16  }
 0x217   :  { %95 = vsyncadd [#allocation3], 4294967280 }
 0x218   :  { %62 = vsyncpa [#allocation3], 1 }

</bundles_post_ra>
